<compile_context>
chip_gen: v7x
topology: tpu7x:2x2x1
jax: 0.10.0
libtpu: 0.0.40
codegen_flags: <defaults>
</compile_context>

<pallas_src>
import jax
import jax.numpy as jnp
from jax import lax
from jax.experimental import pallas as pl
from jax.experimental.pallas import tpu as pltpu


def _make_kernel(use_proj):
    def kernel(*args):
        if use_proj:
            (x_ref, w0_ref, s_ref, wh_ref, ww_ref, w2_ref, wr_ref,
             vmid_ref, vout_ref, out_ref) = args
        else:
            (x_ref, w0_ref, s_ref, wh_ref, ww_ref, w2_ref,
             vmid_ref, vout_ref, out_ref) = args
            wr_ref = None

        NH = x_ref.shape[0]          # N*H rows
        WCm = ww_ref.shape[0]        # W * mid_channels lanes

        # packed per-(w,c) vectors
        c0 = vmid_ref[0:1, :]
        a0 = vmid_ref[1:2, :]
        ba = vmid_ref[2:3, :]
        cb = vmid_ref[3:4, :]
        a1 = vmid_ref[4:5, :]
        c2 = vout_ref[0:1, :]
        a2 = vout_ref[1:2, :]
        aout = vout_ref[2:3, :]

        x = x_ref[...]                                            # (NH, W*Cin)

        # ---- block0: 1x1 conv (+ folded BN) + PReLU (block-diagonal matmul) ----
        y0 = jnp.dot(x, w0_ref[...], preferred_element_type=jnp.float32) + c0
        y0 = jnp.where(y0 >= 0.0, y0, y0 * a0)                    # (NH, WCm)

        # ---- block1a: (5,1) conv over H, padding 2 ----
        # One stacked shift matmul produces all 5 H-shifted (zero-padded) copies,
        # then 5 per-tap block-diagonal channel-mix matmuls accumulate.
        p = jnp.dot(s_ref[...], y0, preferred_element_type=jnp.float32)  # (5*NH, WCm)
        acc = jnp.dot(p[0:NH, :], wh_ref[0], preferred_element_type=jnp.float32)
        for kh in range(1, 5):
            acc = acc + jnp.dot(p[kh * NH:(kh + 1) * NH, :], wh_ref[kh],
                                preferred_element_type=jnp.float32)
        acc = acc + ba

        # ---- block1b: (1,5) conv over W, padding 2 (+ folded BN) + PReLU ----
        # Banded right-matmul: W-shift + zero padding baked into the weight.
        yb = jnp.dot(acc, ww_ref[...], preferred_element_type=jnp.float32) + cb
        y1 = jnp.where(yb >= 0.0, yb, yb * a1)                    # (NH, WCm)

        # ---- block2: 1x1 conv (+ folded BN) + PReLU ----
        y2 = jnp.dot(y1, w2_ref[...], preferred_element_type=jnp.float32) + c2
        y2 = jnp.where(y2 >= 0.0, y2, y2 * a2)                    # (NH, WCout)

        # ---- dropout ----
        # TODO(synk): nn.Dropout is stochastic in training mode; eval-mode identity used.

        # ---- residual branch + output PReLU ----
        if use_proj:  # in_dim > out_dim -> conv_out(input)
            cr = vout_ref[3:4, :]
            ar = vout_ref[4:5, :]
            r = jnp.dot(x, wr_ref[...], preferred_element_type=jnp.float32) + cr
            r = jnp.where(r >= 0.0, r, r * ar)
        else:         # in_dim == out_dim -> identity residual
            r = x

        out = r + y2
        out_ref[...] = jnp.where(out >= 0.0, out, out * aout).astype(out_ref.dtype)

    return kernel


def bottleneck_asym_forward(x, params):
    N, H, W, Cin = x.shape
    Cm = params["w0"].shape[1]
    Cout = params["w2"].shape[1]
    use_proj = "wr" in params
    NH, WCin, WCm, WCout = N * H, W * Cin, W * Cm, W * Cout

    f32 = jnp.float32
    eyeW = jnp.eye(W, dtype=f32)

    # ---- weight restructuring (once, in plain JAX outside the kernel) ----
    w0b = jnp.kron(eyeW, params["w0"])                                   # (WCin, WCm)
    # stacked H-shift matrices (zero boundary padding baked in, no cross-image bleed)
    s_stack = jnp.concatenate(
        [jnp.kron(jnp.eye(N, dtype=f32), jnp.eye(H, k=kh - 2, dtype=f32))
         for kh in range(5)], axis=0)                                    # (5*NH, NH)
    wh = jnp.stack([jnp.kron(eyeW, params["wa"][kh]) for kh in range(5)])  # (5, WCm, WCm)
    ww = sum(jnp.kron(jnp.eye(W, k=2 - kw, dtype=f32), params["wb"][kw])
             for kw in range(5))                                         # (WCm, WCm)
    w2b = jnp.kron(eyeW, params["w2"])                                   # (WCm, WCout)

    def tile_vec(v):
        return jnp.tile(v.reshape(-1), W)                                # (W*C,)

    vmid = jnp.stack([tile_vec(params["c0"]), tile_vec(params["a0"]),
                      tile_vec(params["ba"]), tile_vec(params["cb"]),
                      tile_vec(params["a1"])])                           # (5, WCm)
    vout_rows = [tile_vec(params["c2"]), tile_vec(params["a2"]),
                 tile_vec(params["aout"])]

    args = [x.reshape(NH, WCin), w0b, s_stack, wh, ww, w2b]
    if use_proj:
        args.append(jnp.kron(eyeW, params["wr"]))                        # (WCin, WCout)
        vout_rows += [tile_vec(params["cr"]), tile_vec(params["ar"])]
    vout = jnp.stack(vout_rows)                                          # (3|5, WCout)
    args += [vmid, vout]

    def full_spec(a):
        nd = a.ndim
        return pl.BlockSpec(a.shape, lambda i, _nd=nd: (0,) * _nd)

    in_specs = [full_spec(a) for a in args]
    out_spec = pl.BlockSpec((NH, WCout), lambda i: (0, 0))               # lane-dense

    flops = 2 * NH * (WCin * WCm + 5 * NH * WCm + 5 * WCm * WCm
                      + WCm * WCm + WCm * WCout
                      + (WCin * WCout if use_proj else 0))
    bytes_accessed = 4 * (sum(int(a.size) for a in args) + NH * WCout)

    out2d = pl.pallas_call(
        _make_kernel(use_proj),
        out_shape=jax.ShapeDtypeStruct((NH, WCout), jnp.float32),
        grid_spec=pltpu.PrefetchScalarGridSpec(
            num_scalar_prefetch=0,
            grid=(1,),
            in_specs=in_specs,
            out_specs=out_spec,
        ),
        compiler_params=pltpu.CompilerParams(dimension_semantics=("arbitrary",)),
        cost_estimate=pl.CostEstimate(flops=flops, transcendentals=0,
                                      bytes_accessed=bytes_accessed),
    )(*args)
    return out2d.reshape(N, H, W, Cout)


def init_params(key, in_dim, out_dim, projection_factor):
    """Deterministic synthetic parameters, with eval-mode BN folded into convs."""
    mid = in_dim // projection_factor
    eps = 1e-5
    ks = iter(jax.random.split(key, 24))

    def rnd(shape, scale=0.3):
        return (scale * jax.random.normal(next(ks), shape)).astype(jnp.float32)

    # General eval-mode BN fold: scale = gamma/sqrt(var+eps); bias' = (b-mean)*scale+beta.
    # Synthetic running stats are mean=0, var=1 (fresh nn.BatchNorm2d defaults).
    def fold_bn(w, b, gamma, beta, mean, var):
        scale = gamma / jnp.sqrt(var + eps)
        return w * scale, ((b - mean) * scale + beta)[None, :]

    prelu = 0.25  # PyTorch nn.PReLU() default slope

    # block0: Conv1x1 + BN + PReLU
    w0, b0 = rnd((in_dim, mid)), rnd((mid,))
    g0, be0 = 1.0 + rnd((mid,), 0.1), rnd((mid,), 0.1)
    w0f, c0 = fold_bn(w0, b0, g0, be0, jnp.zeros(mid), jnp.ones(mid))

    # block1: Conv(5,1) + Conv(1,5) + BN + PReLU (BN folded into second conv)
    wa, ba = rnd((5, mid, mid)), rnd((mid,))[None, :]
    wb, bb = rnd((5, mid, mid)), rnd((mid,))
    g1, be1 = 1.0 + rnd((mid,), 0.1), rnd((mid,), 0.1)
    wbf, cb = fold_bn(wb, bb, g1, be1, jnp.zeros(mid), jnp.ones(mid))

    # block2: Conv1x1 + BN + PReLU
    w2, b2 = rnd((mid, out_dim)), rnd((out_dim,))
    g2, be2 = 1.0 + rnd((out_dim,), 0.1), rnd((out_dim,), 0.1)
    w2f, c2 = fold_bn(w2, b2, g2, be2, jnp.zeros(out_dim), jnp.ones(out_dim))

    params = {
        "w0": w0f, "c0": c0, "a0": jnp.full((1, mid), prelu, jnp.float32),
        "wa": wa, "ba": ba,
        "wb": wbf, "cb": cb, "a1": jnp.full((1, mid), prelu, jnp.float32),
        "w2": w2f, "c2": c2, "a2": jnp.full((1, out_dim), prelu, jnp.float32),
        "aout": jnp.full((1, out_dim), prelu, jnp.float32),
    }
    if in_dim > out_dim:  # conv_out projection branch
        wr, br = rnd((in_dim, out_dim)), rnd((out_dim,))
        gr, ber = 1.0 + rnd((out_dim,), 0.1), rnd((out_dim,), 0.1)
        wrf, cr = fold_bn(wr, br, gr, ber, jnp.zeros(out_dim), jnp.ones(out_dim))
        params.update({"wr": wrf, "cr": cr,
                       "ar": jnp.full((1, out_dim), prelu, jnp.float32)})
    return params


def reference_forward(x, params):
    """Plain-JAX NHWC reference matching the PyTorch forward (eval mode)."""
    use_proj = "wr" in params

    def conv1x1(t, w, c):
        return jnp.einsum("nhwc,cd->nhwd", t, w) + c.reshape(1, 1, 1, -1)

    def prelu(t, a):
        return jnp.where(t >= 0.0, t, t * a.reshape(1, 1, 1, -1))

    b0 = prelu(conv1x1(x, params["w0"], params["c0"]), params["a0"])

    ker_a = params["wa"][:, None, :, :]                 # (5,1,Cm,Cm)  HWIO
    ya = lax.conv_general_dilated(b0, ker_a, (1, 1), ((2, 2), (0, 0)),
                                  dimension_numbers=("NHWC", "HWIO", "NHWC"))
    ya = ya + params["ba"].reshape(1, 1, 1, -1)
    ker_b = params["wb"][None, :, :, :]                 # (1,5,Cm,Cm)  HWIO
    yb = lax.conv_general_dilated(ya, ker_b, (1, 1), ((0, 0), (2, 2)),
                                  dimension_numbers=("NHWC", "HWIO", "NHWC"))
    yb = yb + params["cb"].reshape(1, 1, 1, -1)
    b1 = prelu(yb, params["a1"])

    b2 = prelu(conv1x1(b1, params["w2"], params["c2"]), params["a2"])

    r = prelu(conv1x1(x, params["wr"], params["cr"]), params["ar"]) if use_proj else x
    return prelu(r + b2, params["aout"])


if __name__ == "__main__":
    root = jax.random.PRNGKey(0)
    kx1, kp1, kx2, kp2 = jax.random.split(root, 4)

    N, H, W = 2, 16, 16

    # Config A: in_dim > out_dim -> residual goes through conv_out projection.
    in_dim, out_dim, pf = 16, 8, 4
    x = jax.random.normal(kx1, (N, H, W, in_dim), jnp.float32)
    params = init_params(kp1, in_dim, out_dim, pf)
    out = jax.block_until_ready(bottleneck_asym_forward(x, params))
    ref = reference_forward(x, params)
    assert out.shape == (N, H, W, out_dim)
    err = float(jnp.max(jnp.abs(out - ref)))
    assert err < 1e-4, f"projection-branch mismatch: {err}"

    # Config B: in_dim == out_dim -> identity residual.
    in_dim2, out_dim2 = 16, 16
    x2 = jax.random.normal(kx2, (N, H, W, in_dim2), jnp.float32)
    params2 = init_params(kp2, in_dim2, out_dim2, pf)
    out2 = jax.block_until_ready(bottleneck_asym_forward(x2, params2))
    ref2 = reference_forward(x2, params2)
    assert out2.shape == (N, H, W, out_dim2)
    err2 = float(jnp.max(jnp.abs(out2 - ref2)))
    assert err2 < 1e-4, f"identity-branch mismatch: {err2}"

    print("KERNEL_OK")
</pallas_src>

<mosaic_0001>
module attributes {stable_mosaic.version = 11 : i64} {
  func.func @kernel(%arg0: i32, %arg1: memref<32x256xf32, #tpu.memory_space<vmem>>, %arg2: memref<256x64xf32, #tpu.memory_space<vmem>>, %arg3: memref<160x32xf32, #tpu.memory_space<vmem>>, %arg4: memref<5x64x64xf32, #tpu.memory_space<vmem>>, %arg5: memref<64x64xf32, #tpu.memory_space<vmem>>, %arg6: memref<64x128xf32, #tpu.memory_space<vmem>>, %arg7: memref<256x128xf32, #tpu.memory_space<vmem>>, %arg8: memref<5x64xf32, #tpu.memory_space<vmem>>, %arg9: memref<5x128xf32, #tpu.memory_space<vmem>>, %arg10: memref<32x128xf32, #tpu.memory_space<vmem>>) attributes {dimension_semantics = [#tpu.dimension_semantics<arbitrary>], iteration_bounds = array<i64: 1>, scalar_prefetch = 0 : i64, scratch_operands = 0 : i64, tpu.core_type = #tpu.core_type<tc>, window_params = [{pipeline_mode = #tpu.pipeline_mode<synchronous>, transform_indices = @transform_0, window_bounds = array<i64: 32, 256>}, {pipeline_mode = #tpu.pipeline_mode<synchronous>, transform_indices = @transform_1, window_bounds = array<i64: 256, 64>}, {pipeline_mode = #tpu.pipeline_mode<synchronous>, transform_indices = @transform_2, window_bounds = array<i64: 160, 32>}, {pipeline_mode = #tpu.pipeline_mode<synchronous>, transform_indices = @transform_3, window_bounds = array<i64: 5, 64, 64>}, {pipeline_mode = #tpu.pipeline_mode<synchronous>, transform_indices = @transform_4, window_bounds = array<i64: 64, 64>}, {pipeline_mode = #tpu.pipeline_mode<synchronous>, transform_indices = @transform_5, window_bounds = array<i64: 64, 128>}, {pipeline_mode = #tpu.pipeline_mode<synchronous>, transform_indices = @transform_6, window_bounds = array<i64: 256, 128>}, {pipeline_mode = #tpu.pipeline_mode<synchronous>, transform_indices = @transform_7, window_bounds = array<i64: 5, 64>}, {pipeline_mode = #tpu.pipeline_mode<synchronous>, transform_indices = @transform_8, window_bounds = array<i64: 5, 128>}, {pipeline_mode = #tpu.pipeline_mode<synchronous>, transform_indices = @transform_9, window_bounds = array<i64: 32, 128>}]} {
    %c0 = arith.constant 0 : index
    %c0_0 = arith.constant 0 : index
    %0 = vector.load %arg8[%c0, %c0_0] : memref<5x64xf32, #tpu.memory_space<vmem>>, vector<1x64xf32>
    %c1 = arith.constant 1 : index
    %c0_1 = arith.constant 0 : index
    %1 = vector.load %arg8[%c1, %c0_1] : memref<5x64xf32, #tpu.memory_space<vmem>>, vector<1x64xf32>
    %c2 = arith.constant 2 : index
    %c0_2 = arith.constant 0 : index
    %2 = vector.load %arg8[%c2, %c0_2] : memref<5x64xf32, #tpu.memory_space<vmem>>, vector<1x64xf32>
    %c3 = arith.constant 3 : index
    %c0_3 = arith.constant 0 : index
    %3 = vector.load %arg8[%c3, %c0_3] : memref<5x64xf32, #tpu.memory_space<vmem>>, vector<1x64xf32>
    %c4 = arith.constant 4 : index
    %c0_4 = arith.constant 0 : index
    %4 = vector.load %arg8[%c4, %c0_4] : memref<5x64xf32, #tpu.memory_space<vmem>>, vector<1x64xf32>
    %c0_5 = arith.constant 0 : index
    %c0_6 = arith.constant 0 : index
    %5 = vector.load %arg9[%c0_5, %c0_6] : memref<5x128xf32, #tpu.memory_space<vmem>>, vector<1x128xf32>
    %c1_7 = arith.constant 1 : index
    %c0_8 = arith.constant 0 : index
    %6 = vector.load %arg9[%c1_7, %c0_8] : memref<5x128xf32, #tpu.memory_space<vmem>>, vector<1x128xf32>
    %c2_9 = arith.constant 2 : index
    %c0_10 = arith.constant 0 : index
    %7 = vector.load %arg9[%c2_9, %c0_10] : memref<5x128xf32, #tpu.memory_space<vmem>>, vector<1x128xf32>
    %c0_11 = arith.constant 0 : index
    %c0_12 = arith.constant 0 : index
    %8 = vector.load %arg1[%c0_11, %c0_12] : memref<32x256xf32, #tpu.memory_space<vmem>>, vector<32x256xf32>
    %c0_13 = arith.constant 0 : index
    %c0_14 = arith.constant 0 : index
    %9 = vector.load %arg2[%c0_13, %c0_14] : memref<256x64xf32, #tpu.memory_space<vmem>>, vector<256x64xf32>
    %cst = arith.constant dense<0.000000e+00> : vector<32x64xf32>
    %10 = tpu.matmul %8, %9, %cst {dimension_numbers = #tpu.dot_dimension_numbers<[1], [0], [0], [1], [0, 0, 1, 1], [], []>} : vector<32x256xf32>, vector<256x64xf32>, vector<32x64xf32> -> vector<32x64xf32>
    %11 = vector.broadcast %0 : vector<1x64xf32> to vector<32x64xf32>
    %12 = arith.addf %10, %11 : vector<32x64xf32>
    %cst_15 = arith.constant 0.000000e+00 : f32
    %13 = vector.broadcast %cst_15 : f32 to vector<32x64xf32>
    %14 = arith.cmpf oge, %12, %13 : vector<32x64xf32>
    %15 = vector.broadcast %1 : vector<1x64xf32> to vector<32x64xf32>
    %16 = arith.mulf %12, %15 : vector<32x64xf32>
    %17 = arith.select %14, %12, %16 : vector<32x64xi1>, vector<32x64xf32>
    %c0_16 = arith.constant 0 : index
    %c0_17 = arith.constant 0 : index
    %18 = vector.load %arg3[%c0_16, %c0_17] : memref<160x32xf32, #tpu.memory_space<vmem>>, vector<160x32xf32>
    %cst_18 = arith.constant dense<0.000000e+00> : vector<160x64xf32>
    %19 = tpu.matmul %18, %17, %cst_18 {dimension_numbers = #tpu.dot_dimension_numbers<[1], [0], [0], [1], [0, 0, 1, 1], [], []>} : vector<160x32xf32>, vector<32x64xf32>, vector<160x64xf32> -> vector<160x64xf32>
    %20 = vector.extract_strided_slice %19 {offsets = [0, 0], sizes = [32, 64], strides = [1, 1]} : vector<160x64xf32> to vector<32x64xf32>
    %c0_19 = arith.constant 0 : index
    %c0_20 = arith.constant 0 : index
    %c0_21 = arith.constant 0 : index
    %21 = vector.load %arg4[%c0_19, %c0_20, %c0_21] : memref<5x64x64xf32, #tpu.memory_space<vmem>>, vector<1x64x64xf32>
    %22 = vector.shape_cast %21 : vector<1x64x64xf32> to vector<64x64xf32>
    %cst_22 = arith.constant dense<0.000000e+00> : vector<32x64xf32>
    %23 = tpu.matmul %20, %22, %cst_22 {dimension_numbers = #tpu.dot_dimension_numbers<[1], [0], [0], [1], [0, 0, 1, 1], [], []>} : vector<32x64xf32>, vector<64x64xf32>, vector<32x64xf32> -> vector<32x64xf32>
    %24 = vector.extract_strided_slice %19 {offsets = [32, 0], sizes = [32, 64], strides = [1, 1]} : vector<160x64xf32> to vector<32x64xf32>
    %c1_23 = arith.constant 1 : index
    %c0_24 = arith.constant 0 : index
    %c0_25 = arith.constant 0 : index
    %25 = vector.load %arg4[%c1_23, %c0_24, %c0_25] : memref<5x64x64xf32, #tpu.memory_space<vmem>>, vector<1x64x64xf32>
    %26 = vector.shape_cast %25 : vector<1x64x64xf32> to vector<64x64xf32>
    %cst_26 = arith.constant dense<0.000000e+00> : vector<32x64xf32>
    %27 = tpu.matmul %24, %26, %cst_26 {dimension_numbers = #tpu.dot_dimension_numbers<[1], [0], [0], [1], [0, 0, 1, 1], [], []>} : vector<32x64xf32>, vector<64x64xf32>, vector<32x64xf32> -> vector<32x64xf32>
    %28 = arith.addf %23, %27 : vector<32x64xf32>
    %29 = vector.extract_strided_slice %19 {offsets = [64, 0], sizes = [32, 64], strides = [1, 1]} : vector<160x64xf32> to vector<32x64xf32>
    %c2_27 = arith.constant 2 : index
    %c0_28 = arith.constant 0 : index
    %c0_29 = arith.constant 0 : index
    %30 = vector.load %arg4[%c2_27, %c0_28, %c0_29] : memref<5x64x64xf32, #tpu.memory_space<vmem>>, vector<1x64x64xf32>
    %31 = vector.shape_cast %30 : vector<1x64x64xf32> to vector<64x64xf32>
    %cst_30 = arith.constant dense<0.000000e+00> : vector<32x64xf32>
    %32 = tpu.matmul %29, %31, %cst_30 {dimension_numbers = #tpu.dot_dimension_numbers<[1], [0], [0], [1], [0, 0, 1, 1], [], []>} : vector<32x64xf32>, vector<64x64xf32>, vector<32x64xf32> -> vector<32x64xf32>
    %33 = arith.addf %28, %32 : vector<32x64xf32>
    %34 = vector.extract_strided_slice %19 {offsets = [96, 0], sizes = [32, 64], strides = [1, 1]} : vector<160x64xf32> to vector<32x64xf32>
    %c3_31 = arith.constant 3 : index
    %c0_32 = arith.constant 0 : index
    %c0_33 = arith.constant 0 : index
    %35 = vector.load %arg4[%c3_31, %c0_32, %c0_33] : memref<5x64x64xf32, #tpu.memory_space<vmem>>, vector<1x64x64xf32>
    %36 = vector.shape_cast %35 : vector<1x64x64xf32> to vector<64x64xf32>
    %cst_34 = arith.constant dense<0.000000e+00> : vector<32x64xf32>
    %37 = tpu.matmul %34, %36, %cst_34 {dimension_numbers = #tpu.dot_dimension_numbers<[1], [0], [0], [1], [0, 0, 1, 1], [], []>} : vector<32x64xf32>, vector<64x64xf32>, vector<32x64xf32> -> vector<32x64xf32>
    %38 = arith.addf %33, %37 : vector<32x64xf32>
    %39 = vector.extract_strided_slice %19 {offsets = [128, 0], sizes = [32, 64], strides = [1, 1]} : vector<160x64xf32> to vector<32x64xf32>
    %c4_35 = arith.constant 4 : index
    %c0_36 = arith.constant 0 : index
    %c0_37 = arith.constant 0 : index
    %40 = vector.load %arg4[%c4_35, %c0_36, %c0_37] : memref<5x64x64xf32, #tpu.memory_space<vmem>>, vector<1x64x64xf32>
    %41 = vector.shape_cast %40 : vector<1x64x64xf32> to vector<64x64xf32>
    %cst_38 = arith.constant dense<0.000000e+00> : vector<32x64xf32>
    %42 = tpu.matmul %39, %41, %cst_38 {dimension_numbers = #tpu.dot_dimension_numbers<[1], [0], [0], [1], [0, 0, 1, 1], [], []>} : vector<32x64xf32>, vector<64x64xf32>, vector<32x64xf32> -> vector<32x64xf32>
    %43 = arith.addf %38, %42 : vector<32x64xf32>
    %44 = vector.broadcast %2 : vector<1x64xf32> to vector<32x64xf32>
    %45 = arith.addf %43, %44 : vector<32x64xf32>
    %c0_39 = arith.constant 0 : index
    %c0_40 = arith.constant 0 : index
    %46 = vector.load %arg5[%c0_39, %c0_40] : memref<64x64xf32, #tpu.memory_space<vmem>>, vector<64x64xf32>
    %cst_41 = arith.constant dense<0.000000e+00> : vector<32x64xf32>
    %47 = tpu.matmul %45, %46, %cst_41 {dimension_numbers = #tpu.dot_dimension_numbers<[1], [0], [0], [1], [0, 0, 1, 1], [], []>} : vector<32x64xf32>, vector<64x64xf32>, vector<32x64xf32> -> vector<32x64xf32>
    %48 = vector.broadcast %3 : vector<1x64xf32> to vector<32x64xf32>
    %49 = arith.addf %47, %48 : vector<32x64xf32>
    %cst_42 = arith.constant 0.000000e+00 : f32
    %50 = vector.broadcast %cst_42 : f32 to vector<32x64xf32>
    %51 = arith.cmpf oge, %49, %50 : vector<32x64xf32>
    %52 = vector.broadcast %4 : vector<1x64xf32> to vector<32x64xf32>
    %53 = arith.mulf %49, %52 : vector<32x64xf32>
    %54 = arith.select %51, %49, %53 : vector<32x64xi1>, vector<32x64xf32>
    %c0_43 = arith.constant 0 : index
    %c0_44 = arith.constant 0 : index
    %55 = vector.load %arg6[%c0_43, %c0_44] : memref<64x128xf32, #tpu.memory_space<vmem>>, vector<64x128xf32>
    %cst_45 = arith.constant dense<0.000000e+00> : vector<32x128xf32>
    %56 = tpu.matmul %54, %55, %cst_45 {dimension_numbers = #tpu.dot_dimension_numbers<[1], [0], [0], [1], [0, 0, 1, 1], [], []>} : vector<32x64xf32>, vector<64x128xf32>, vector<32x128xf32> -> vector<32x128xf32>
    %57 = vector.broadcast %5 : vector<1x128xf32> to vector<32x128xf32>
    %58 = arith.addf %56, %57 : vector<32x128xf32>
    %cst_46 = arith.constant 0.000000e+00 : f32
    %59 = vector.broadcast %cst_46 : f32 to vector<32x128xf32>
    %60 = arith.cmpf oge, %58, %59 : vector<32x128xf32>
    %61 = vector.broadcast %6 : vector<1x128xf32> to vector<32x128xf32>
    %62 = arith.mulf %58, %61 : vector<32x128xf32>
    %63 = arith.select %60, %58, %62 : vector<32x128xi1>, vector<32x128xf32>
    %c3_47 = arith.constant 3 : index
    %c0_48 = arith.constant 0 : index
    %64 = vector.load %arg9[%c3_47, %c0_48] : memref<5x128xf32, #tpu.memory_space<vmem>>, vector<1x128xf32>
    %c4_49 = arith.constant 4 : index
    %c0_50 = arith.constant 0 : index
    %65 = vector.load %arg9[%c4_49, %c0_50] : memref<5x128xf32, #tpu.memory_space<vmem>>, vector<1x128xf32>
    %c0_51 = arith.constant 0 : index
    %c0_52 = arith.constant 0 : index
    %66 = vector.load %arg7[%c0_51, %c0_52] : memref<256x128xf32, #tpu.memory_space<vmem>>, vector<256x128xf32>
    %cst_53 = arith.constant dense<0.000000e+00> : vector<32x128xf32>
    %67 = tpu.matmul %8, %66, %cst_53 {dimension_numbers = #tpu.dot_dimension_numbers<[1], [0], [0], [1], [0, 0, 1, 1], [], []>} : vector<32x256xf32>, vector<256x128xf32>, vector<32x128xf32> -> vector<32x128xf32>
    %68 = vector.broadcast %64 : vector<1x128xf32> to vector<32x128xf32>
    %69 = arith.addf %67, %68 : vector<32x128xf32>
    %cst_54 = arith.constant 0.000000e+00 : f32
    %70 = vector.broadcast %cst_54 : f32 to vector<32x128xf32>
    %71 = arith.cmpf oge, %69, %70 : vector<32x128xf32>
    %72 = vector.broadcast %65 : vector<1x128xf32> to vector<32x128xf32>
    %73 = arith.mulf %69, %72 : vector<32x128xf32>
    %74 = arith.select %71, %69, %73 : vector<32x128xi1>, vector<32x128xf32>
    %75 = arith.addf %74, %63 : vector<32x128xf32>
    %cst_55 = arith.constant 0.000000e+00 : f32
    %76 = vector.broadcast %cst_55 : f32 to vector<32x128xf32>
    %77 = arith.cmpf oge, %75, %76 : vector<32x128xf32>
    %78 = vector.broadcast %7 : vector<1x128xf32> to vector<32x128xf32>
    %79 = arith.mulf %75, %78 : vector<32x128xf32>
    %80 = arith.select %77, %75, %79 : vector<32x128xi1>, vector<32x128xf32>
    %c0_56 = arith.constant 0 : index
    %c0_57 = arith.constant 0 : index
    %81 = vector.load %arg10[%c0_56, %c0_57] : memref<32x128xf32, #tpu.memory_space<vmem>>, vector<32x128xf32>
    tpu.vector_store %arg10[%c0_56, %c0_57], %80 {strides = array<i32>} : memref<32x128xf32, #tpu.memory_space<vmem>>, vector<32x128xf32>,
    return
  }
  func.func @transform_0(%arg0: i32) -> (i32, i32) {
    %c0_i32 = arith.constant 0 : i32
    %c0_i32_0 = arith.constant 0 : i32
    %c0_i32_1 = arith.constant 0 : i32
    return %c0_i32, %c0_i32_0 : i32, i32
  }
  func.func @transform_1(%arg0: i32) -> (i32, i32) {
    %c0_i32 = arith.constant 0 : i32
    %c0_i32_0 = arith.constant 0 : i32
    %c0_i32_1 = arith.constant 0 : i32
    return %c0_i32, %c0_i32_0 : i32, i32
  }
  func.func @transform_2(%arg0: i32) -> (i32, i32) {
    %c0_i32 = arith.constant 0 : i32
    %c0_i32_0 = arith.constant 0 : i32
    %c0_i32_1 = arith.constant 0 : i32
    return %c0_i32, %c0_i32_0 : i32, i32
  }
  func.func @transform_3(%arg0: i32) -> (i32, i32, i32) {
    %c0_i32 = arith.constant 0 : i32
    %c0_i32_0 = arith.constant 0 : i32
    %c0_i32_1 = arith.constant 0 : i32
    %c0_i32_2 = arith.constant 0 : i32
    return %c0_i32, %c0_i32_0, %c0_i32_1 : i32, i32, i32
  }
  func.func @transform_4(%arg0: i32) -> (i32, i32) {
    %c0_i32 = arith.constant 0 : i32
    %c0_i32_0 = arith.constant 0 : i32
    %c0_i32_1 = arith.constant 0 : i32
    return %c0_i32, %c0_i32_0 : i32, i32
  }
  func.func @transform_5(%arg0: i32) -> (i32, i32) {
    %c0_i32 = arith.constant 0 : i32
    %c0_i32_0 = arith.constant 0 : i32
    %c0_i32_1 = arith.constant 0 : i32
    return %c0_i32, %c0_i32_0 : i32, i32
  }
  func.func @transform_6(%arg0: i32) -> (i32, i32) {
    %c0_i32 = arith.constant 0 : i32
    %c0_i32_0 = arith.constant 0 : i32
    %c0_i32_1 = arith.constant 0 : i32
    return %c0_i32, %c0_i32_0 : i32, i32
  }
  func.func @transform_7(%arg0: i32) -> (i32, i32) {
    %c0_i32 = arith.constant 0 : i32
    %c0_i32_0 = arith.constant 0 : i32
    %c0_i32_1 = arith.constant 0 : i32
    return %c0_i32, %c0_i32_0 : i32, i32
  }
  func.func @transform_8(%arg0: i32) -> (i32, i32) {
    %c0_i32 = arith.constant 0 : i32
    %c0_i32_0 = arith.constant 0 : i32
    %c0_i32_1 = arith.constant 0 : i32
    return %c0_i32, %c0_i32_0 : i32, i32
  }
  func.func @transform_9(%arg0: i32) -> (i32, i32) {
    %c0_i32 = arith.constant 0 : i32
    %c0_i32_0 = arith.constant 0 : i32
    %c0_i32_1 = arith.constant 0 : i32
    return %c0_i32, %c0_i32_0 : i32, i32
  }
}

</mosaic_0001>

<bundles_post_ra>
// kernel: tpu_custom_call.1
= control target key start
LH: loop header
LB: loop body
LE: loop exit
PB: predicated region body
PF: predicated region fallthrough
CT: control target
= control target key end

     0   :  { %14 = vsyncpa [#allocation3], 0  ;;  %s2831_s0 = inlined_call_operand.hbm [shape: f32[32,256], index: 0, kind: input, shape index: {}]   ;;  %s2832_s1 = inlined_call_operand.vmem [shape: f32[256,64], index: 1, kind: input, shape index: {}]   ;;  %s2833_s2 = inlined_call_operand.vmem [shape: f32[160,32], index: 2, kind: input, shape index: {}]   ;;  %s2834_s3 = inlined_call_operand.vmem [shape: f32[5,64,64], index: 3, kind: input, shape index: {}]   ;;  %s2835_s4 = inlined_call_operand.hbm [shape: f32[64,64], index: 4, kind: input, shape index: {}]   ;;  %s2836_s5 = inlined_call_operand.hbm [shape: f32[64,128], index: 5, kind: input, shape index: {}]   ;;  %s2837_s6 = inlined_call_operand.vmem [shape: f32[256,128], index: 6, kind: input, shape index: {}]   ;;  %s2838_s7 = inlined_call_operand.vmem [shape: f32[5,64], index: 7, kind: input, shape index: {}]   ;;  %s2839_s8 = inlined_call_operand.vmem [shape: f32[5,128], index: 8, kind: input, shape index: {}]   ;;  %s2840_s9 = inlined_call_operand.hbm [shape: f32[32,128], index: 9, kind: output, shape index: {}]  }
   0x1   :  { %15 = vsyncpa [#allocation6], 0 }
   0x2   :  { %16 = vsyncpa [#allocation4], 0  ;;  %s2234_s30 = smov [#allocation5]   ;;  %s2140_s13 = scalar_lea.hbm %s2835_s4, 1024 }
   0x3   :  { %s40_s10 = sshll.u32 %s2234_s30, 4  ;;  %p2141_p0 = scmp.ne.s32.totalorder %s2835_s4, %s2140_s13  ;;  %s41_s10 = int_to_ptr.vmem [resolvable:$true] %s40_s10 }
   0x4   :  { %p2144_p1 = scmp.lt.u32.totalorder %s2140_s13, %s2835_s4 }
   0x6   :  { %p2146_p2 = pnand %p2144_p1, %p2141_p0 }
   0x8   :  { %2149 = shalt.err (!%p2146_p2)
}
   0x9   :  { %s2150_s18 = scalar_lea.vmem %s41_s10, 1024  ;;  %p2155_p4 = scmp.lt.s32.totalorder %s41_s10, %s41_s10 }
   0xa   :  { %p2151_p3 = scmp.ne.s32.totalorder %s41_s10, %s2150_s18  ;;  %p2156_p5 = scmp.lt.s32.totalorder %s2150_s18, %s2150_s18 }
   0xc   :  { %p2157_p6 = por %p2156_p5, %p2155_p4 }
   0xe   :  { %p2158_p7 = pnand %p2157_p6, %p2151_p3 }
  0x10   :  { %2161 = shalt.err (!%p2158_p7)
}
  0x11   :  { %s2235_s19 = smov 128   ;;  %s2236_s20 = smov 8  }
  0x12   :  { %46 = dma.hbm_to_vmem [thread:$0]  %s2835_s4, 1024, %s41_s10, [#allocation6], %s2235_s19, %s2235_s19, %s2236_s20  }
  0x13   :  { %s2237_s23 = smov [#allocation2]   ;;  %s2162_s27 = scalar_lea.hbm %s2831_s0, 1024 }
  0x14   :  { %s22_s24 = sshll.u32 %s2237_s23, 4  ;;  %p2163_p8 = scmp.ne.s32.totalorder %s2831_s0, %s2162_s27  ;;  %s23_s24 = int_to_ptr.vmem [resolvable:$true] %s22_s24 }
  0x15   :  { %p2166_p9 = scmp.lt.u32.totalorder %s2162_s27, %s2831_s0 }
  0x17   :  { %p2168_p10 = pnand %p2166_p9, %p2163_p8 }
  0x19   :  { %2171 = shalt.err (!%p2168_p10)
}
  0x1a   :  { %s2172_s12 = scalar_lea.vmem %s23_s24, 1024  ;;  %p2177_p12 = scmp.lt.s32.totalorder %s23_s24, %s23_s24 }
  0x1b   :  { %p2173_p11 = scmp.ne.s32.totalorder %s23_s24, %s2172_s12  ;;  %p2178_p13 = scmp.lt.s32.totalorder %s2172_s12, %s2172_s12 }
  0x1d   :  { %p2179_p0 = por %p2178_p13, %p2177_p12 }
  0x1f   :  { %p2180_p1 = pnand %p2179_p0, %p2173_p11 }
  0x21   :  { %2183 = shalt.err (!%p2180_p1)
}
  0x22   :  { %s2238_s4 = smov 256   ;;  %s2239_s10 = smov 16  }
  0x23   :  { %28 = dma.hbm_to_vmem [thread:$0]  %s2831_s0, 1024, %s23_s24, [#allocation3], %s2238_s4, %s2238_s4, %s2239_s10  }
  0x24   :  { %s2240_s15 = smov [#allocation7]   ;;  %s2184_s21 = scalar_lea.hbm %s2836_s5, 1024 }
  0x25   :  { %s52_s16 = sshll.u32 %s2240_s15, 4  ;;  %p2185_p2 = scmp.ne.s32.totalorder %s2836_s5, %s2184_s21  ;;  %s53_s16 = int_to_ptr.vmem [resolvable:$true] %s52_s16 }
  0x26   :  { %p2188_p3 = scmp.lt.u32.totalorder %s2184_s21, %s2836_s5 }
  0x28   :  { %p2190_p4 = pnand %p2188_p3, %p2185_p2 }
  0x2a   :  { %2193 = shalt.err (!%p2190_p4)
}
  0x2b   :  { %s2194_s27 = scalar_lea.vmem %s53_s16, 1024  ;;  %p2199_p6 = scmp.lt.s32.totalorder %s53_s16, %s53_s16 }
  0x2c   :  { %p2195_p5 = scmp.ne.s32.totalorder %s53_s16, %s2194_s27  ;;  %p2200_p7 = scmp.lt.s32.totalorder %s2194_s27, %s2194_s27 }
  0x2e   :  { %p2201_p8 = por %p2200_p7, %p2199_p6 }
  0x30   :  { %p2202_p9 = pnand %p2201_p8, %p2195_p5 }
  0x32   :  { %2205 = shalt.err (!%p2202_p9)
}
  0x33   :  { %58 = dma.hbm_to_vmem [thread:$0]  %s2836_s5, 1024, %s53_s16, [#allocation6], %s2235_s19, %s2235_s19, %s2236_s20  }
  0x34   :  { %2228 = dma.done.wait [#allocation3], 1024  }
  0x35   :  { %2229 = vsyncadd [#allocation3], 4294966272 }
  0x36   :  { %2230 = dma.done.wait [#allocation6], 2048  }
  0x37   :  { %2231 = vsyncadd [#allocation6], 4294965248  ;;  %v106_v0 = vld [vmem:[%s2832_s1 + $0x80] sm:$0xff]  ;;  %v107_v1 = vld [vmem:[%s2832_s1 + $0x88] sm:$0xff]  ;;  %vm247_vm0 = vcmask 261120   ;;  %vm490_vm5 = vcmask 523264  }
  0x38   :  { %v90_v2 = vld [vmem:[%s2832_s1] sm:$0xff]  ;;  %v1932_v3 = vpack.c.bf16 %v107_v1, %v106_v0  ;;  %v91_v4 = vld [vmem:[%s2832_s1 + $0x8] sm:$0xff]  ;;  %v108_v5 = vld [vmem:[%s2832_s1 + $0x90] sm:$0xff] }
  0x39   :  { %v109_v6 = vld [vmem:[%s2832_s1 + $0x98] sm:$0xff]  ;;  %v1934_v7 = vpack.c.bf16 %v91_v4, %v90_v2  ;;  %v92_v9 = vld [vmem:[%s2832_s1 + $0x10] sm:$0xff]  ;;  %v110_v11 = vld [vmem:[%s2832_s1 + $0xa0] sm:$0xff] }
  0x3a   :  { %v1936_v8 = vpack.c.bf16 %v109_v6, %v108_v5  ;;  %v93_v10 = vld [vmem:[%s2832_s1 + $0x18] sm:$0xff]  ;;  %1933 = vmatprep.subr.bf16.mxu0 %v1932_v3  ;;  %v111_v12 = vld [vmem:[%s2832_s1 + $0xa8] sm:$0xff]  ;;  %v94_v15 = vld [vmem:[%s2832_s1 + $0x20] sm:$0xff] }
  0x3b   :  { %1935 = vmatpush3.bf16.msra.mxu0 %v1934_v7  ;;  %v1938_v13 = vpack.c.bf16 %v93_v10, %v92_v9  ;;  %v1940_v14 = vpack.c.bf16 %v111_v12, %v110_v11  ;;  %v95_v16 = vld [vmem:[%s2832_s1 + $0x28] sm:$0xff]  ;;  %v112_v17 = vld [vmem:[%s2832_s1 + $0xb0] sm:$0xff]  ;;  %v113_v18 = vld [vmem:[%s2832_s1 + $0xb8] sm:$0xff] }
  0x3c   :  { %1937 = vmatprep.subr.bf16.mxu0 %v1936_v8  ;;  %v1942_v19 = vpack.c.bf16 %v95_v16, %v94_v15  ;;  %v1944_v20 = vpack.c.bf16 %v113_v18, %v112_v17  ;;  %v96_v21 = vld [vmem:[%s2832_s1 + $0x30] sm:$0xff]  ;;  %v97_v22 = vld [vmem:[%s2832_s1 + $0x38] sm:$0xff]  ;;  %v114_v23 = vld [vmem:[%s2832_s1 + $0xc0] sm:$0xff] }
  0x3d   :  { %v115_v24 = vld [vmem:[%s2832_s1 + $0xc8] sm:$0xff]  ;;  %v1946_v26 = vpack.c.bf16 %v97_v22, %v96_v21  ;;  %v98_v28 = vld [vmem:[%s2832_s1 + $0x40] sm:$0xff]  ;;  %v116_v30 = vld [vmem:[%s2832_s1 + $0xd0] sm:$0xff] }
  0x3e   :  { %v2388_v25 = vld [vmem:[#allocation2 + $0x8] sm:$0xff]  ;;  %v1948_v27 = vpack.c.bf16 %v115_v24, %v114_v23  ;;  %v117_v31 = vld [vmem:[%s2832_s1 + $0xd8] sm:$0xff]  ;;  %v100_v34 = vld [vmem:[%s2832_s1 + $0x50] sm:$0xff] }
  0x3f   :  { %1939 = vmatpush3.bf16.msra.mxu0 %v1938_v13  ;;  %190 = vmatprep.mubr.f32.mxu0 %v2388_v25  ;;  %v99_v29 = vld [vmem:[%s2832_s1 + $0x48] sm:$0xff]  ;;  %v1952_v33 = vpack.c.bf16 %v117_v31, %v116_v30  ;;  %v101_v35 = vld [vmem:[%s2832_s1 + $0x58] sm:$0xff]  ;;  %v118_v36 = vld [vmem:[%s2832_s1 + $0xe0] sm:$0xff] }
  0x40   :  { %1941 = vmatprep.subr.bf16.mxu0 %v1940_v14  ;;  %v1950_v32 = vpack.c.bf16 %v99_v29, %v98_v28  ;;  %v119_v37 = vld [vmem:[%s2832_s1 + $0xe8] sm:$0xff]  ;;  %v1954_v38 = vpack.c.bf16 %v101_v35, %v100_v34  ;;  %v102_v40 = vld [vmem:[%s2832_s1 + $0x60] sm:$0xff]  ;;  %v120_v42 = vld [vmem:[%s2832_s1 + $0xf0] sm:$0xff] }
  0x41   :  { %v1956_v39 = vpack.c.bf16 %v119_v37, %v118_v36  ;;  %v103_v41 = vld [vmem:[%s2832_s1 + $0x68] sm:$0xff]  ;;  %v121_v43 = vld [vmem:[%s2832_s1 + $0xf8] sm:$0xff]  ;;  %v104_v46 = vld [vmem:[%s2832_s1 + $0x70] sm:$0xff] }
  0x42   :  { %v1958_v44 = vpack.c.bf16 %v103_v41, %v102_v40  ;;  %v1960_v45 = vpack.c.bf16 %v121_v43, %v120_v42  ;;  %v105_v47 = vld [vmem:[%s2832_s1 + $0x78] sm:$0xff]  ;;  %v2433_v49 = vld [vmem:[#allocation2] sm:$0xff]  ;;  %v2439_v51 = vld [vmem:[#allocation2 + $0x10] sm:$0xff] }
  0x43   :  { %1943 = vmatpush3.bf16.msra.mxu0 %v1942_v19  ;;  %v1962_v48 = vpack.c.bf16 %v105_v47, %v104_v46  ;;  %v2435_v50 = vld [vmem:[#allocation2 + $0x18] sm:$0xff]  ;;  %v2441_v52 = vld [vmem:[#allocation2 + $0x28] sm:$0xff]  ;;  %v2445_v53 = vld [vmem:[#allocation2 + $0x20] sm:$0xff] }
  0x44   :  { %1945 = vmatprep.subr.bf16.mxu0 %v1944_v20  ;;  %v2447_v54 = vld [vmem:[#allocation2 + $0x38] sm:$0xff]  ;;  %v2451_v55 = vld [vmem:[#allocation2 + $0x30] sm:$0xff]  ;;  %v227_v56 = vld [vmem:[%s2833_s2] sm:$0xff] }
  0x45   :  { %1748 = vmatprep.mubr.msk.f32.mxu1 %vm247_vm0, %v227_v56  ;;  %v1476_v57 = vld [vmem:[%s2834_s3 + $0x40] sm:$0xff]  ;;  %v1477_v58 = vld [vmem:[%s2834_s3 + $0x48] sm:$0xff]  ;;  %v1478_v59 = vld [vmem:[%s2834_s3 + $0x50] sm:$0xff] }
  0x46   :  { %v1972_v60 = vpack.c.bf16 %v1477_v58, %v1476_v57  ;;  %v1479_v61 = vld [vmem:[%s2834_s3 + $0x58] sm:$0xff]  ;;  %v1454_v0 = vld [vmem:[%s2838_s7] ss:$0 sm:$0xff]  ;;  %v1455_v6 = vld [vmem:[%s2838_s7 + $0x1] ss:$0 sm:$0xff] }
  0x47   :  { %1947 = vmatpush3.bf16.msra.mxu0 %v1946_v26  ;;  %v1976_v62 = vpack.c.bf16 %v1479_v61, %v1478_v59  ;;  %v228_v28 = vld [vmem:[%s2833_s2 + $0x8] sm:$0xff]  ;;  %v229_v29 = vld [vmem:[%s2833_s2 + $0x10] sm:$0xff]  ;;  %v230_v30 = vld [vmem:[%s2833_s2 + $0x18] sm:$0xff] }
  0x48   :  { %1949 = vmatprep.subr.bf16.mxu0 %v1948_v27  ;;  %v231_v31 = vld [vmem:[%s2833_s2 + $0x20] sm:$0xff]  ;;  %v234_v34 = vld [vmem:[%s2833_s2 + $0x38] sm:$0xff]  ;;  %v236_v36 = vld [vmem:[%s2833_s2 + $0x48] sm:$0xff] }
  0x49   :  { %v235_v35 = vld [vmem:[%s2833_s2 + $0x40] sm:$0xff]  ;;  %v237_v37 = vld [vmem:[%s2833_s2 + $0x50] sm:$0xff]  ;;  %v240_v40 = vld [vmem:[%s2833_s2 + $0x68] sm:$0xff] }
  0x4a   :  { %v241_v41 = vld [vmem:[%s2833_s2 + $0x70] sm:$0xff]  ;;  %v242_v42 = vld [vmem:[%s2833_s2 + $0x78] sm:$0xff]  ;;  %v243_v43 = vld [vmem:[%s2833_s2 + $0x80] sm:$0xff] }
  0x4b   :  { %1951 = vmatpush3.bf16.msra.mxu0 %v1950_v32  ;;  %v232_v32 = vld [vmem:[%s2833_s2 + $0x28] sm:$0xff]  ;;  %v246_v46 = vld [vmem:[%s2833_s2 + $0x98] sm:$0xff]  ;;  %v1480_v47 = vld [vmem:[%s2834_s3 + $0x60] sm:$0xff] }
  0x4c   :  { %1953 = vmatprep.subr.bf16.mxu0 %v1952_v33  ;;  %v233_v33 = vld [vmem:[%s2833_s2 + $0x30] sm:$0xff]  ;;  %v1483_v58 = vld [vmem:[%s2834_s3 + $0x78] sm:$0xff]  ;;  %v474_v61 = vld [vmem:[%s2834_s3 + $0x8] sm:$0xff] }
  0x4d   :  { %v1482_v57 = vld [vmem:[%s2834_s3 + $0x70] sm:$0xff] }
  0x4e   :  { %v1984_v59 = vpack.c.bf16 %v1483_v58, %v1482_v57  ;;  %v1504_v58 = vld [vmem:[%s2834_s3 + $0xc0] sm:$0xff] }
  0x4f   :  { %1955 = vmatpush3.bf16.msra.mxu0 %v1954_v38  ;;  %v238_v38 = vld [vmem:[%s2833_s2 + $0x58] sm:$0xff] }
  0x50   :  { %1957 = vmatprep.subr.bf16.mxu0 %v1956_v39  ;;  %v239_v39 = vld [vmem:[%s2833_s2 + $0x60] sm:$0xff] }
  0x53   :  { %1959 = vmatpush3.bf16.msra.mxu0 %v1958_v44  ;;  %v244_v44 = vld [vmem:[%s2833_s2 + $0x88] sm:$0xff] }
  0x54   :  { %1961 = vmatprep.subr.bf16.mxu0 %v1960_v45  ;;  %v245_v45 = vld [vmem:[%s2833_s2 + $0x90] sm:$0xff] }
  0x57   :  { %1963 = vmatpush3.bf16.msra.mxu0 %v1962_v48  ;;  %v1481_v48 = vld [vmem:[%s2834_s3 + $0x68] sm:$0xff] }
  0x58   :  { %1973 = vmatprep.subr.bf16.mxu0 %v1972_v60  ;;  %v1980_v56 = vpack.c.bf16 %v1481_v48, %v1480_v47  ;;  %v1499_v47 = vld [vmem:[%s2834_s3 + $0xb8] sm:$0xff] }
  0x5a   :  { %191 = vmatmul.mubr.f32.vlgmr.msra.gmra.mrb[0].mxu0 %v2433_v49 }
  0x5b   :  { %195 = vmatprep.mubr.f32.mxu0 %v2435_v50  ;;  %1975 = vmatpush3.bf16.msra.mxu0 %v1972_v60  ;;  %v473_v60 = vld [vmem:[%s2834_s3] sm:$0xff] }
  0x5c   :  { %1977 = vmatprep.subr.bf16.mxu0 %v1976_v62 }
  0x5e   :  { %196 = vmatmul.mubr.f32.gmra.mrb[2].mxu0 %v2439_v51 }
  0x5f   :  { %200 = vmatprep.mubr.f32.mxu0 %v2441_v52  ;;  %1979 = vmatpush3.bf16.msra.mxu0 %v1976_v62  ;;  %v1988_v62 = vpack.c.bf16 %v474_v61, %v473_v60 }
  0x60   :  { %1981 = vmatprep.subr.bf16.mxu0 %v1980_v56 }
  0x62   :  { %201 = vmatmul.mubr.f32.gmra.mrb[4].mxu0 %v2445_v53 }
  0x63   :  { %205 = vmatprep.mubr.f32.mxu0 %v2447_v54  ;;  %1983 = vmatpush3.bf16.msra.mxu0 %v1980_v56 }
  0x64   :  { %1985 = vmatprep.subr.bf16.mxu0 %v1984_v59 }
  0x66   :  { %206 = vmatmul.mubr.f32.gmra.mrb[6].mxu0 %v2451_v55 }
  0x67   :  { %1987 = vmatpush3.bf16.msra.mxu0 %v1984_v59  ;;  %v1505_v59 = vld [vmem:[%s2834_s3 + $0xc8] sm:$0xff] }
  0x68   :  { %1989 = vmatprep.subr.bf16.mxu0 %v1988_v62  ;;  %v2020_v61 = vpack.c.bf16 %v1505_v59, %v1504_v58  ;;  %v1275_v58 = vld [vmem:[%s2837_s6] sm:$0xff]  ;;  %v1276_v59 = vld [vmem:[%s2837_s6 + $0x8] sm:$0xff] }
 0x12d   :  { %v1576_v63 = vpop.f32.mrb[0].mxu0 }
 0x12e   :  { %v1577_v1 = vpop.f32.mrb[1].mxu0 }
 0x12f   :  { %v1578_v2 = vadd.f32 %v1577_v1, %v1576_v63  ;;  %v1023_v63 = vld [vmem:[#allocation5] sm:$0xff]  ;;  %v1025_v1 = vld [vmem:[#allocation5 + $0x10] sm:$0xff] }
 0x131   :  { %v193_v3 = vadd.f32 %v1578_v2, %v1454_v0  ;;  %v1579_v4 = vpop.f32.mrb[2].mxu0 }
 0x132   :  { %v1580_v5 = vpop.f32.mrb[3].mxu0 }
 0x133   :  { %v1581_v7 = vadd.f32 %v1580_v5, %v1579_v4  ;;  %v219_v10 = vmul.f32 %v1455_v6, %v193_v3  ;;  %vm211_vm1 = vcmp.ge.f32.partialorder %v193_v3, 0.0  ;;  %v1027_v5 = vld [vmem:[#allocation5 + $0x20] sm:$0xff] }
 0x135   :  { %v198_v8 = vadd.f32 %v1581_v7, %v1454_v0  ;;  %v1582_v9 = vpop.f32.mrb[4].mxu0  ;;  %v223_v16 = vsel %vm211_vm1, %v193_v3, %v219_v10  ;;  %v1026_v3 = vld [vmem:[#allocation5 + $0x18] sm:$0xff] }
 0x136   :  { %v1583_v11 = vpop.f32.mrb[5].mxu0  ;;  %v2056_v4 = vpack.c.bf16 %v1026_v3, %v1025_v1  ;;  %v1509_v3 = vld [vmem:[%s2834_s3 + $0xe8] sm:$0xff] }
 0x137   :  { %v1584_v12 = vadd.f32 %v1583_v11, %v1582_v9  ;;  %vm212_vm2 = vcmp.ge.f32.partialorder %v198_v8, 0.0  ;;  %v220_v13 = vmul.f32 %v1455_v6, %v198_v8  ;;  %v1030_v9 = vld [vmem:[#allocation5 + $0x38] sm:$0xff] }
 0x139   :  { %v203_v14 = vadd.f32 %v1584_v12, %v1454_v0  ;;  %v1585_v15 = vpop.f32.mrb[6].mxu0  ;;  %v224_v17 = vsel %vm212_vm2, %v198_v8, %v220_v13  ;;  %v1029_v8 = vld [vmem:[#allocation5 + $0x30] sm:$0xff] }
 0x13a   :  { %v1586_v18 = vpop.f32.mrb[7].mxu0  ;;  %v1964_v19 = vpack.c.bf16 %v224_v17, %v223_v16  ;;  %v2064_v10 = vpack.c.bf16 %v1030_v9, %v1029_v8  ;;  %v476_v16 = vld [vmem:[%s2834_s3 + $0x18] sm:$0xff]  ;;  %v1516_v8 = vld [vmem:[%s2834_s3 + $0x100] sm:$0xff]  ;;  %v1517_v9 = vld [vmem:[%s2834_s3 + $0x108] sm:$0xff] }
 0x13b   :  { %v1587_v20 = vadd.f32 %v1586_v18, %v1585_v15  ;;  %v221_v21 = vmul.f32 %v1455_v6, %v203_v14  ;;  %vm213_vm3 = vcmp.ge.f32.partialorder %v203_v14, 0.0  ;;  %v475_v15 = vld [vmem:[%s2834_s3 + $0x10] sm:$0xff] }
 0x13c   :  { %1965 = vmatprep.subr.bf16.mxu1 %v1964_v19 }
 0x13d   :  { %v208_v22 = vadd.f32 %v1587_v20, %v1454_v0  ;;  %1967 = vmatpush3.bf16.msra.mxu1 %v1964_v19  ;;  %v225_v24 = vsel %vm213_vm3, %v203_v14, %v221_v21  ;;  %v1024_v0 = vld [vmem:[#allocation5 + $0x8] sm:$0xff]  ;;  %v1992_v19 = vpack.c.bf16 %v476_v16, %v475_v15  ;;  %v477_v20 = vld [vmem:[%s2834_s3 + $0x20] sm:$0xff] }
 0x13e   :  { %v2052_v2 = vpack.c.bf16 %v1024_v0, %v1023_v63  ;;  %v478_v21 = vld [vmem:[%s2834_s3 + $0x28] sm:$0xff]  ;;  %v1506_v63 = vld [vmem:[%s2834_s3 + $0xd0] sm:$0xff]  ;;  %v1507_v0 = vld [vmem:[%s2834_s3 + $0xd8] sm:$0xff] }
 0x13f   :  { %vm214_vm4 = vcmp.ge.f32.partialorder %v208_v22, 0.0  ;;  %v222_v23 = vmul.f32 %v1455_v6, %v208_v22  ;;  %v1028_v6 = vld [vmem:[#allocation5 + $0x28] sm:$0xff]  ;;  %v2024_v1 = vpack.c.bf16 %v1507_v0, %v1506_v63 }
 0x140   :  { %v2060_v7 = vpack.c.bf16 %v1028_v6, %v1027_v5  ;;  %v1510_v5 = vld [vmem:[%s2834_s3 + $0xf0] sm:$0xff]  ;;  %v1511_v6 = vld [vmem:[%s2834_s3 + $0xf8] sm:$0xff]  ;;  %v1521_v15 = vld [vmem:[%s2834_s3 + $0x128] sm:$0xff] }
 0x141   :  { %v226_v26 = vsel %vm214_vm4, %v208_v22, %v222_v23 }
 0x142   :  { %v1968_v27 = vpack.c.bf16 %v226_v26, %v225_v24  ;;  %v1996_v24 = vpack.c.bf16 %v478_v21, %v477_v20  ;;  %v479_v26 = vld [vmem:[%s2834_s3 + $0x30] sm:$0xff]  ;;  %v1148_v20 = vld [vmem:[#allocation7] sm:$0xff]  ;;  %v1149_v21 = vld [vmem:[#allocation7 + $0x8] sm:$0xff] }
 0x144   :  { %1969 = vmatprep.subr.bf16.mxu1 %v1968_v27 }
 0x145   :  { %1971 = vmatpush3.bf16.msra.mxu1 %v1968_v27  ;;  %v480_v27 = vld [vmem:[%s2834_s3 + $0x38] sm:$0xff] }
 0x146   :  { %2053 = vmatprep.subr.bf16.mxu1 %v2052_v2 }
 0x148   :  { %1749 = vmatmul.mubr.msk.f32.vlgmr.msra.gmra.mrb[0].mxu1 %vm247_vm0, %v228_v28 }
 0x149   :  { %1751 = vmatprep.mubr.msk.f32.mxu1 %vm247_vm0, %v229_v29  ;;  %2055 = vmatpush3.bf16.msra.mxu1 %v2052_v2  ;;  %v2000_v29 = vpack.c.bf16 %v480_v27, %v479_v26  ;;  %v1508_v2 = vld [vmem:[%s2834_s3 + $0xe0] sm:$0xff]  ;;  %v1150_v26 = vld [vmem:[#allocation7 + $0x10] sm:$0xff]  ;;  %v1151_v27 = vld [vmem:[#allocation7 + $0x18] sm:$0xff] }
 0x14a   :  { %2057 = vmatprep.subr.bf16.mxu1 %v2056_v4 }
 0x14c   :  { %1752 = vmatmul.mubr.msk.f32.gmra.mrb[2].mxu1 %vm247_vm0, %v230_v30 }
 0x14d   :  { %1754 = vmatprep.mubr.msk.f32.mxu1 %vm247_vm0, %v231_v31  ;;  %2059 = vmatpush3.bf16.msra.mxu1 %v2056_v4  ;;  %v1492_v31 = vld [vmem:[%s2834_s3 + $0x80] sm:$0xff]  ;;  %v2028_v4 = vpack.c.bf16 %v1509_v3, %v1508_v2  ;;  %v2086_v3 = vpack.c.bf16 %v1276_v59, %v1275_v58 }
 0x14e   :  { %2061 = vmatprep.subr.bf16.mxu1 %v2060_v7 }
 0x150   :  { %1755 = vmatmul.mubr.msk.f32.gmra.mrb[4].mxu1 %vm247_vm0, %v232_v32  ;;  %v1493_v32 = vld [vmem:[%s2834_s3 + $0x88] sm:$0xff] }
 0x151   :  { %1757 = vmatprep.mubr.msk.f32.mxu1 %vm247_vm0, %v233_v33  ;;  %2063 = vmatpush3.bf16.msra.mxu1 %v2060_v7  ;;  %v2032_v7 = vpack.c.bf16 %v1511_v6, %v1510_v5 }
 0x152   :  { %2065 = vmatprep.subr.bf16.mxu1 %v2064_v10 }
 0x154   :  { %1758 = vmatmul.mubr.msk.f32.gmra.mrb[6].mxu1 %vm247_vm0, %v234_v34  ;;  %v2004_v34 = vpack.c.bf16 %v1493_v32, %v1492_v31  ;;  %v2072_v31 = vpack.c.bf16 %v1151_v27, %v1150_v26  ;;  %v1282_v26 = vld [vmem:[%s2837_s6 + $0x38] sm:$0xff]  ;;  %v1299_v27 = vld [vmem:[%s2837_s6 + $0xc0] sm:$0xff] }
 0x155   :  { %1760 = vmatprep.mubr.msk.f32.mxu1 %vm247_vm0, %v235_v35  ;;  %2067 = vmatpush3.bf16.msra.mxu1 %v2064_v10  ;;  %v2036_v10 = vpack.c.bf16 %v1517_v9, %v1516_v8  ;;  %v1278_v8 = vld [vmem:[%s2837_s6 + $0x18] sm:$0xff] }
 0x158   :  { %1761 = vmatmul.mubr.msk.f32.gmra.mrb[8].mxu1 %vm247_vm0, %v236_v36  ;;  %v1494_v36 = vld [vmem:[%s2834_s3 + $0x90] sm:$0xff] }
 0x159   :  { %1763 = vmatprep.mubr.msk.f32.mxu1 %vm247_vm0, %v237_v37  ;;  %v1495_v37 = vld [vmem:[%s2834_s3 + $0x98] sm:$0xff] }
 0x15c   :  { %1764 = vmatmul.mubr.msk.f32.gmra.mrb[10].mxu1 %vm247_vm0, %v238_v38 }
 0x15d   :  { %1766 = vmatprep.mubr.msk.f32.mxu1 %vm247_vm0, %v239_v39  ;;  %v2008_v39 = vpack.c.bf16 %v1495_v37, %v1494_v36 }
 0x160   :  { %1767 = vmatmul.mubr.msk.f32.gmra.mrb[12].mxu1 %vm247_vm0, %v240_v40 }
 0x161   :  { %1769 = vmatprep.mubr.msk.f32.mxu1 %vm247_vm0, %v241_v41  ;;  %v1496_v41 = vld [vmem:[%s2834_s3 + $0xa0] sm:$0xff] }
 0x164   :  { %1770 = vmatmul.mubr.msk.f32.gmra.mrb[14].mxu1 %vm247_vm0, %v242_v42  ;;  %v1497_v42 = vld [vmem:[%s2834_s3 + $0xa8] sm:$0xff] }
 0x165   :  { %1772 = vmatprep.mubr.msk.f32.mxu1 %vm247_vm0, %v243_v43 }
 0x168   :  { %1773 = vmatmul.mubr.msk.f32.gmra.mrb[16].mxu1 %vm247_vm0, %v244_v44  ;;  %v2012_v44 = vpack.c.bf16 %v1497_v42, %v1496_v41  ;;  %v1291_v42 = vld [vmem:[%s2837_s6 + $0x80] sm:$0xff] }
 0x169   :  { %1775 = vmatprep.mubr.msk.f32.mxu1 %vm247_vm0, %v245_v45 }
 0x16c   :  { %1776 = vmatmul.mubr.msk.f32.gmra.mrb[18].mxu1 %vm247_vm0, %v246_v46  ;;  %v1498_v46 = vld [vmem:[%s2834_s3 + $0xb0] sm:$0xff] }
 0x16d   :  { %v2016_v56 = vpack.c.bf16 %v1499_v47, %v1498_v46  ;;  %v1534_v46 = vld [vmem:[%s2838_s7 + $0x4] ss:$0 sm:$0xff] }
 0x21b   :  { %v1750_v11 = vpop.f32.mrb[0].mxu1 }
 0x21c   :  { %v374_v12 = vpop.f32.mrb[1].mxu1 }
 0x21f   :  { %v1753_v13 = vpop.f32.mrb[2].mxu1 }
 0x220   :  { %v384_v14 = vpop.f32.mrb[3].mxu1 }
 0x223   :  { %v1756_v17 = vpop.f32.mrb[4].mxu1 }
 0x224   :  { %v394_v18 = vpop.f32.mrb[5].mxu1 }
 0x225   :  { %1794 = vmatprep.mubr.msk.f32.mxu0 %vm490_vm5, %v394_v18  ;;  %v1523_v18 = vld [vmem:[%s2834_s3 + $0x138] sm:$0xff] }
 0x226   :  { %1795 = vmatmul.mubr.msk.f32.vlgmr.msra.gmra.mrb[8].mxu0 %vm490_vm5, %v1756_v17  ;;  %v1522_v17 = vld [vmem:[%s2834_s3 + $0x130] sm:$0xff] }
 0x227   :  { %1991 = vmatpush3.bf16.msra.mxu0 %v1988_v62  ;;  %v1759_v22 = vpop.f32.mrb[6].mxu1 }
 0x228   :  { %v404_v23 = vpop.f32.mrb[7].mxu1  ;;  %1993 = vmatprep.subr.bf16.mxu0 %v1992_v19 }
 0x229   :  { %1797 = vmatprep.mubr.msk.f32.mxu0 %vm490_vm5, %v404_v23  ;;  %v1528_v23 = vld [vmem:[%s2838_s7 + $0x2] ss:$0 sm:$0xff] }
 0x22a   :  { %1798 = vmatmul.mubr.msk.f32.gmra.mrb[10].mxu0 %vm490_vm5, %v1759_v22  ;;  %v2068_v22 = vpack.c.bf16 %v1149_v21, %v1148_v20  ;;  %v1297_v20 = vld [vmem:[%s2837_s6 + $0xb0] sm:$0xff]  ;;  %v1298_v21 = vld [vmem:[%s2837_s6 + $0xb8] sm:$0xff] }
 0x22b   :  { %1995 = vmatpush3.bf16.msra.mxu0 %v1992_v19  ;;  %1816 = vmatprep.mubr.msk.f32.mxu0 %vm490_vm5, %v374_v12  ;;  %v1762_v28 = vpop.f32.mrb[8].mxu1  ;;  %v1519_v12 = vld [vmem:[%s2834_s3 + $0x118] sm:$0xff]  ;;  %v2048_v19 = vpack.c.bf16 %v1523_v18, %v1522_v17  ;;  %v1279_v17 = vld [vmem:[%s2837_s6 + $0x20] sm:$0xff]  ;;  %v1280_v18 = vld [vmem:[%s2837_s6 + $0x28] sm:$0xff] }
 0x22c   :  { %1997 = vmatprep.subr.bf16.mxu0 %v1996_v24  ;;  %v414_v30 = vpop.f32.mrb[9].mxu1  ;;  %2069 = vmatprep.subr.bf16.mxu1 %v2068_v22 }
 0x22f   :  { %1999 = vmatpush3.bf16.msra.mxu0 %v1996_v24  ;;  %v1765_v33 = vpop.f32.mrb[10].mxu1 }
 0x230   :  { %2001 = vmatprep.subr.bf16.mxu0 %v2000_v29  ;;  %v424_v35 = vpop.f32.mrb[11].mxu1 }
 0x233   :  { %2003 = vmatpush3.bf16.msra.mxu0 %v2000_v29  ;;  %v1768_v38 = vpop.f32.mrb[12].mxu1 }
 0x234   :  { %2005 = vmatprep.subr.bf16.mxu0 %v2004_v34  ;;  %v434_v40 = vpop.f32.mrb[13].mxu1 }
 0x236   :  { %1817 = vmatmul.mubr.msk.f32.vlgmr.msra.gmra.mrb[8].mxu0 %vm490_vm5, %v1750_v11  ;;  %v1518_v11 = vld [vmem:[%s2834_s3 + $0x110] sm:$0xff] }
 0x237   :  { %1819 = vmatprep.mubr.msk.f32.mxu0 %vm490_vm5, %v384_v14  ;;  %2007 = vmatpush3.bf16.msra.mxu0 %v2004_v34  ;;  %v1771_v43 = vpop.f32.mrb[14].mxu1  ;;  %v1520_v14 = vld [vmem:[%s2834_s3 + $0x120] sm:$0xff]  ;;  %v1153_v34 = vld [vmem:[#allocation7 + $0x28] sm:$0xff] }
 0x238   :  { %2009 = vmatprep.subr.bf16.mxu0 %v2008_v39  ;;  %v444_v45 = vpop.f32.mrb[15].mxu1  ;;  %v2044_v16 = vpack.c.bf16 %v1521_v15, %v1520_v14 }
 0x23a   :  { %1820 = vmatmul.mubr.msk.f32.gmra.mrb[10].mxu0 %vm490_vm5, %v1753_v13  ;;  %v2040_v13 = vpack.c.bf16 %v1519_v12, %v1518_v11  ;;  %v1295_v11 = vld [vmem:[%s2837_s6 + $0xa0] sm:$0xff]  ;;  %v1296_v12 = vld [vmem:[%s2837_s6 + $0xa8] sm:$0xff] }
 0x23b   :  { %2011 = vmatpush3.bf16.msra.mxu0 %v2008_v39  ;;  %1838 = vmatprep.mubr.msk.f32.mxu0 %vm490_vm5, %v414_v30  ;;  %v1774_v48 = vpop.f32.mrb[16].mxu1  ;;  %v1154_v39 = vld [vmem:[#allocation7 + $0x30] sm:$0xff] }
 0x23c   :  { %2013 = vmatprep.subr.bf16.mxu0 %v2012_v44  ;;  %v454_v57 = vpop.f32.mrb[17].mxu1 }
 0x23f   :  { %2015 = vmatpush3.bf16.msra.mxu0 %v2012_v44  ;;  %v1777_v60 = vpop.f32.mrb[18].mxu1 }
 0x240   :  { %2017 = vmatprep.subr.bf16.mxu0 %v2016_v56  ;;  %v464_v62 = vpop.f32.mrb[19].mxu1 }
 0x243   :  { %2019 = vmatpush3.bf16.msra.mxu0 %v2016_v56 }
 0x244   :  { %2021 = vmatprep.subr.bf16.mxu0 %v2020_v61 }
 0x246   :  { %1839 = vmatmul.mubr.msk.f32.vlgmr.msra.gmra.mrb[8].mxu0 %vm490_vm5, %v1762_v28 }
 0x247   :  { %2023 = vmatpush3.bf16.msra.mxu0 %v2020_v61  ;;  %1841 = vmatprep.mubr.msk.f32.mxu0 %vm490_vm5, %v424_v35  ;;  %v1293_v61 = vld [vmem:[%s2837_s6 + $0x90] sm:$0xff] }
 0x248   :  { %2025 = vmatprep.subr.bf16.mxu0 %v2024_v1 }
 0x24a   :  { %1842 = vmatmul.mubr.msk.f32.gmra.mrb[10].mxu0 %vm490_vm5, %v1765_v33  ;;  %v1152_v33 = vld [vmem:[#allocation7 + $0x20] sm:$0xff] }
 0x24b   :  { %2027 = vmatpush3.bf16.msra.mxu0 %v2024_v1  ;;  %1860 = vmatprep.mubr.msk.f32.mxu0 %vm490_vm5, %v434_v40  ;;  %v1155_v40 = vld [vmem:[#allocation7 + $0x38] sm:$0xff] }
 0x24c   :  { %2029 = vmatprep.subr.bf16.mxu0 %v2028_v4  ;;  %v2080_v41 = vpack.c.bf16 %v1155_v40, %v1154_v39  ;;  %v1304_v39 = vld [vmem:[%s2837_s6 + $0xe8] sm:$0xff] }
 0x24f   :  { %2031 = vmatpush3.bf16.msra.mxu0 %v2028_v4 }
 0x250   :  { %2033 = vmatprep.subr.bf16.mxu0 %v2032_v7 }
 0x253   :  { %2035 = vmatpush3.bf16.msra.mxu0 %v2032_v7  ;;  %v1277_v7 = vld [vmem:[%s2837_s6 + $0x10] sm:$0xff] }
 0x254   :  { %2037 = vmatprep.subr.bf16.mxu0 %v2036_v10  ;;  %v2090_v14 = vpack.c.bf16 %v1278_v8, %v1277_v7 }
 0x256   :  { %1861 = vmatmul.mubr.msk.f32.vlgmr.msra.gmra.mrb[8].mxu0 %vm490_vm5, %v1768_v38  ;;  %v2076_v38 = vpack.c.bf16 %v1153_v34, %v1152_v33  ;;  %v1302_v33 = vld [vmem:[%s2837_s6 + $0xd8] sm:$0xff] }
 0x257   :  { %2039 = vmatpush3.bf16.msra.mxu0 %v2036_v10  ;;  %1863 = vmatprep.mubr.msk.f32.mxu0 %vm490_vm5, %v444_v45  ;;  %v1529_v45 = vld [vmem:[%s2838_s7 + $0x3] ss:$0 sm:$0xff] }
 0x258   :  { %2041 = vmatprep.subr.bf16.mxu0 %v2040_v13 }
 0x25a   :  { %1864 = vmatmul.mubr.msk.f32.gmra.mrb[10].mxu0 %vm490_vm5, %v1771_v43  ;;  %v1292_v43 = vld [vmem:[%s2837_s6 + $0x88] sm:$0xff] }
 0x25b   :  { %2043 = vmatpush3.bf16.msra.mxu0 %v2040_v13  ;;  %1882 = vmatprep.mubr.msk.f32.mxu0 %vm490_vm5, %v454_v57  ;;  %v2084_v44 = vpack.c.bf16 %v1292_v43, %v1291_v42  ;;  %v1287_v42 = vld [vmem:[%s2837_s6 + $0x60] sm:$0xff]  ;;  %v1288_v43 = vld [vmem:[%s2837_s6 + $0x68] sm:$0xff] }
 0x25c   :  { %2045 = vmatprep.subr.bf16.mxu0 %v2044_v16 }
 0x25f   :  { %2047 = vmatpush3.bf16.msra.mxu0 %v2044_v16  ;;  %v2092_v16 = vpack.c.bf16 %v1296_v12, %v1295_v11 }
 0x260   :  { %2049 = vmatprep.subr.bf16.mxu0 %v2048_v19 }
 0x263   :  { %2051 = vmatpush3.bf16.msra.mxu0 %v2048_v19 }
 0x266   :  { %1883 = vmatmul.mubr.msk.f32.vlgmr.msra.gmra.mrb[8].mxu0 %vm490_vm5, %v1774_v48 }
 0x267   :  { %1885 = vmatprep.mubr.msk.f32.mxu0 %vm490_vm5, %v464_v62  ;;  %v1294_v62 = vld [vmem:[%s2837_s6 + $0x98] sm:$0xff] }
 0x268   :  { %v2088_v6 = vpack.c.bf16 %v1294_v62, %v1293_v61 }
 0x26a   :  { %1886 = vmatmul.mubr.msk.f32.gmra.mrb[10].mxu0 %vm490_vm5, %v1777_v60 }
 0x339   :  { %v1884_v24 = vpop.f32.mrb[8].mxu0 }
 0x33a   :  { %v992_v28 = vpop.f32.mrb[9].mxu0  ;;  %v1020_v30 = vadd.f32 %v1884_v24, %v1528_v23  ;;  %v1281_v24 = vld [vmem:[%s2837_s6 + $0x30] sm:$0xff] }
 0x33b   :  { %v1019_v29 = vadd.f32 %v1528_v23, %v992_v28  ;;  %v1300_v28 = vld [vmem:[%s2837_s6 + $0xc8] sm:$0xff] }
 0x33d   :  { %v1887_v32 = vpop.f32.mrb[10].mxu0  ;;  %1904 = vmatprep.mubr.msk.f32.mxu1 %vm490_vm5, %v1019_v29  ;;  %v2100_v29 = vpack.c.bf16 %v1300_v28, %v1299_v27 }
 0x33e   :  { %v1002_v35 = vpop.f32.mrb[11].mxu0  ;;  %1905 = vmatmul.mubr.msk.f32.vlgmr.msra.gmra.mrb[20].mxu1 %vm490_vm5, %v1020_v30  ;;  %v1022_v37 = vadd.f32 %v1887_v32, %v1528_v23  ;;  %v1283_v30 = vld [vmem:[%s2837_s6 + $0x40] sm:$0xff]  ;;  %v1301_v32 = vld [vmem:[%s2837_s6 + $0xd0] sm:$0xff] }
 0x33f   :  { %v1021_v36 = vadd.f32 %v1528_v23, %v1002_v35  ;;  %2071 = vmatpush3.bf16.msra.mxu1 %v2068_v22  ;;  %v2094_v22 = vpack.c.bf16 %v1280_v18, %v1279_v17  ;;  %v2096_v23 = vpack.c.bf16 %v1298_v21, %v1297_v20  ;;  %v2104_v35 = vpack.c.bf16 %v1302_v33, %v1301_v32 }
 0x340   :  { %2073 = vmatprep.subr.bf16.mxu1 %v2072_v31 }
 0x341   :  { %1907 = vmatprep.mubr.msk.f32.mxu1 %vm490_vm5, %v1021_v36  ;;  %v1285_v36 = vld [vmem:[%s2837_s6 + $0x50] sm:$0xff] }
 0x342   :  { %1908 = vmatmul.mubr.msk.f32.gmra.mrb[22].mxu1 %vm490_vm5, %v1022_v37  ;;  %v1286_v37 = vld [vmem:[%s2837_s6 + $0x58] sm:$0xff] }
 0x343   :  { %2075 = vmatpush3.bf16.msra.mxu1 %v2072_v31  ;;  %v1284_v31 = vld [vmem:[%s2837_s6 + $0x48] sm:$0xff]  ;;  %v2106_v40 = vpack.c.bf16 %v1286_v37, %v1285_v36 }
 0x344   :  { %2077 = vmatprep.subr.bf16.mxu1 %v2076_v38  ;;  %v2102_v34 = vpack.c.bf16 %v1284_v31, %v1283_v30 }
 0x347   :  { %2079 = vmatpush3.bf16.msra.mxu1 %v2076_v38  ;;  %v1303_v38 = vld [vmem:[%s2837_s6 + $0xe0] sm:$0xff] }
 0x348   :  { %2081 = vmatprep.subr.bf16.mxu1 %v2080_v41 }
 0x34b   :  { %2083 = vmatpush3.bf16.msra.mxu1 %v2080_v41  ;;  %v2108_v41 = vpack.c.bf16 %v1304_v39, %v1303_v38 }
 0x34c   :  { %2085 = vmatprep.subr.bf16.mxu1 %v2084_v44  ;;  %v1305_v44 = vld [vmem:[%s2837_s6 + $0xf0] sm:$0xff] }
 0x411   :  { %v1906_v47 = vpop.f32.mrb[20].mxu1 }
 0x412   :  { %v1119_v48 = vadd.f32 %v1906_v47, %v1529_v45  ;;  %v1113_v56 = vpop.f32.mrb[21].mxu1 }
 0x413   :  { %v1114_v57 = vadd.f32 %v1529_v45, %v1113_v56  ;;  %v1290_v56 = vld [vmem:[%s2837_s6 + $0x78] sm:$0xff] }
 0x414   :  { %v1141_v60 = vmul.f32 %v1534_v46, %v1119_v48  ;;  %vm1133_vm6 = vcmp.ge.f32.partialorder %v1119_v48, 0.0 }
 0x415   :  { %vm1132_vm7 = vcmp.ge.f32.partialorder %v1114_v57, 0.0  ;;  %v1140_v63 = vmul.f32 %v1534_v46, %v1114_v57  ;;  %v1909_v0 = vpop.f32.mrb[22].mxu1 }
 0x416   :  { %v1129_v1 = vadd.f32 %v1909_v0, %v1529_v45  ;;  %v1123_v2 = vpop.f32.mrb[23].mxu1  ;;  %v1145_v9 = vsel %vm1133_vm6, %v1119_v48, %v1141_v60  ;;  %v1289_v48 = vld [vmem:[%s2837_s6 + $0x70] sm:$0xff] }
 0x417   :  { %v1124_v4 = vadd.f32 %v1529_v45, %v1123_v2  ;;  %v1144_v5 = vsel %vm1132_vm7, %v1114_v57, %v1140_v63  ;;  %v1306_v45 = vld [vmem:[%s2837_s6 + $0xf8] sm:$0xff]  ;;  %v2114_v57 = vpack.c.bf16 %v1290_v56, %v1289_v48  ;;  %v1542_v63 = vld [vmem:[%s2839_s8 + $0x4] ss:$0 sm:$0xff] }
 0x418   :  { %v1143_v10 = vmul.f32 %v1534_v46, %v1129_v1  ;;  %1926 = vmatprep.mubr.msk.f32.mxu1 %vm490_vm5, %v1144_v5  ;;  %vm1135_vm8 = vcmp.ge.f32.partialorder %v1129_v1, 0.0  ;;  %v2112_v47 = vpack.c.bf16 %v1306_v45, %v1305_v44 }
 0x419   :  { %vm1134_vm9 = vcmp.ge.f32.partialorder %v1124_v4, 0.0  ;;  %v1142_v13 = vmul.f32 %v1534_v46, %v1124_v4  ;;  %1927 = vmatmul.mubr.msk.f32.vlgmr.msra.gmra.mrb[24].mxu1 %vm490_vm5, %v1145_v9  ;;  %v2110_v46 = vpack.c.bf16 %v1288_v43, %v1287_v42  ;;  %v1543_v9 = vld [vmem:[%s2839_s8 + $0x2] ss:$0 sm:$0xff] }
 0x41a   :  { %2087 = vmatpush3.bf16.msra.mxu1 %v2086_v3  ;;  %v1147_v19 = vsel %vm1135_vm8, %v1129_v1, %v1143_v10 }
 0x41b   :  { %v1146_v15 = vsel %vm1134_vm9, %v1124_v4, %v1142_v13  ;;  %2089 = vmatprep.subr.bf16.mxu1 %v2088_v6 }
 0x41c   :  { %1929 = vmatprep.mubr.msk.f32.mxu1 %vm490_vm5, %v1146_v15 }
 0x41d   :  { %1930 = vmatmul.mubr.msk.f32.gmra.mrb[26].mxu1 %vm490_vm5, %v1147_v19 }
 0x41e   :  { %2091 = vmatpush3.bf16.msra.mxu1 %v2090_v14  ;;  %1375 = vmatprep.mubr.f32.mxu1 %v2388_v25  ;;  %v2098_v25 = vpack.c.bf16 %v1282_v26, %v1281_v24 }
 0x41f   :  { %2093 = vmatprep.subr.bf16.mxu1 %v2092_v16 }
 0x422   :  { %2095 = vmatpush3.bf16.msra.mxu1 %v2094_v22 }
 0x423   :  { %2097 = vmatprep.subr.bf16.mxu1 %v2096_v23 }
 0x426   :  { %2099 = vmatpush3.bf16.msra.mxu1 %v2098_v25 }
 0x427   :  { %2101 = vmatprep.subr.bf16.mxu1 %v2100_v29 }
 0x42a   :  { %2103 = vmatpush3.bf16.msra.mxu1 %v2102_v34 }
 0x42b   :  { %2105 = vmatprep.subr.bf16.mxu1 %v2104_v35 }
 0x42e   :  { %2107 = vmatpush3.bf16.msra.mxu1 %v2106_v40 }
 0x42f   :  { %2109 = vmatprep.subr.bf16.mxu1 %v2108_v41 }
 0x432   :  { %2111 = vmatpush3.bf16.msra.mxu1 %v2110_v46 }
 0x433   :  { %2113 = vmatprep.subr.bf16.mxu1 %v2112_v47 }
 0x436   :  { %2115 = vmatpush3.bf16.msra.mxu1 %v2114_v57 }
 0x439   :  { %1376 = vmatmul.mubr.f32.vlgmr.msra.gmra.mrb[28].mxu1 %v2433_v49  ;;  %v1535_v49 = vld [vmem:[%s2839_s8] ss:$0 sm:$0xff] }
 0x43a   :  { %1380 = vmatprep.mubr.f32.mxu1 %v2435_v50 }
 0x43d   :  { %1381 = vmatmul.mubr.f32.gmra.mrb[30].mxu1 %v2439_v51  ;;  %v1540_v51 = vld [vmem:[%s2839_s8 + $0x1] ss:$0 sm:$0xff] }
 0x43e   :  { %1385 = vmatprep.mubr.f32.mxu1 %v2441_v52  ;;  %v1541_v52 = vld [vmem:[%s2839_s8 + $0x3] ss:$0 sm:$0xff]  ;;  %s2241_s8 = smov [#allocation8]  }
 0x43f   :  { %s1441_s11 = sshll.u32 %s2241_s8, 4  ;;  %s1442_s11 = int_to_ptr.vmem [resolvable:$true] %s1441_s11 }
 0x440   :  { %s2206_s12 = scalar_lea.vmem %s1442_s11, 512  ;;  %p2211_p11 = scmp.lt.s32.totalorder %s1442_s11, %s1442_s11 }
 0x441   :  { %1386 = vmatmul.mubr.f32.gmra.mrb[32].mxu1 %v2445_v53  ;;  %p2207_p10 = scmp.ne.s32.totalorder %s1442_s11, %s2206_s12  ;;  %p2212_p12 = scmp.lt.s32.totalorder %s2206_s12, %s2206_s12 }
 0x442   :  { %1390 = vmatprep.mubr.f32.mxu1 %v2447_v54 }
 0x443   :  { %p2213_p13 = por %p2212_p12, %p2211_p11 }
 0x445   :  { %1391 = vmatmul.mubr.f32.gmra.mrb[34].mxu1 %v2451_v55  ;;  %p2214_p0 = pnand %p2213_p13, %p2207_p10 }
 0x4ec   :  { %v1928_v58 = vpop.f32.mrb[24].mxu1 }
 0x4ed   :  { %v1238_v59 = vpop.f32.mrb[25].mxu1  ;;  %v1244_v55 = vadd.f32 %v1928_v58, %v1535_v49 }
 0x4ee   :  { %v1239_v62 = vadd.f32 %v1535_v49, %v1238_v59 }
 0x4ef   :  { %vm1258_vm12 = vcmp.ge.f32.partialorder %v1244_v55, 0.0  ;;  %v1266_v6 = vmul.f32 %v1540_v51, %v1244_v55 }
 0x4f0   :  { %v1931_v60 = vpop.f32.mrb[26].mxu1  ;;  %v1265_v0 = vmul.f32 %v1540_v51, %v1239_v62  ;;  %vm1257_vm10 = vcmp.ge.f32.partialorder %v1239_v62, 0.0 }
 0x4f1   :  { %v1248_v61 = vpop.f32.mrb[27].mxu1  ;;  %v1270_v17 = vsel %vm1258_vm12, %v1244_v55, %v1266_v6  ;;  %v1254_v19 = vadd.f32 %v1931_v60, %v1535_v49 }
 0x4f2   :  { %v1269_v7 = vsel %vm1257_vm10, %v1239_v62, %v1265_v0  ;;  %v1249_v8 = vadd.f32 %v1535_v49, %v1248_v61 }
 0x4f3   :  { %v1268_v30 = vmul.f32 %v1540_v51, %v1254_v19  ;;  %vm1260_vm2 = vcmp.ge.f32.partialorder %v1254_v19, 0.0 }
 0x4f4   :  { %v1267_v20 = vmul.f32 %v1540_v51, %v1249_v8  ;;  %vm1259_vm15 = vcmp.ge.f32.partialorder %v1249_v8, 0.0 }
 0x4f5   :  { %v1272_v38 = vsel %vm1260_vm2, %v1254_v19, %v1268_v30 }
 0x4f6   :  { %v1271_v31 = vsel %vm1259_vm15, %v1249_v8, %v1267_v20 }
 0x50c   :  { %v1728_v50 = vpop.f32.mrb[28].mxu1 }
 0x50d   :  { %v1729_v53 = vpop.f32.mrb[29].mxu1 }
 0x50e   :  { %v1730_v54 = vadd.f32 %v1729_v53, %v1728_v50 }
 0x510   :  { %v1378_v1 = vadd.f32 %v1730_v54, %v1541_v52  ;;  %v1731_v2 = vpop.f32.mrb[30].mxu1 }
 0x511   :  { %v1732_v3 = vpop.f32.mrb[31].mxu1 }
 0x512   :  { %vm1396_vm11 = vcmp.ge.f32.partialorder %v1378_v1, 0.0  ;;  %v1404_v4 = vmul.f32 %v1542_v63, %v1378_v1  ;;  %v1733_v5 = vadd.f32 %v1732_v3, %v1731_v2 }
 0x514   :  { %v1408_v10 = vsel %vm1396_vm11, %v1378_v1, %v1404_v4  ;;  %v1383_v11 = vadd.f32 %v1733_v5, %v1541_v52  ;;  %v1734_v12 = vpop.f32.mrb[32].mxu1 }
 0x515   :  { %v1412_v13 = vadd.f32 %v1408_v10, %v1269_v7  ;;  %v1735_v14 = vpop.f32.mrb[33].mxu1 }
 0x516   :  { %vm1397_vm13 = vcmp.ge.f32.partialorder %v1383_v11, 0.0  ;;  %v1405_v15 = vmul.f32 %v1542_v63, %v1383_v11  ;;  %v1736_v16 = vadd.f32 %v1735_v14, %v1734_v12 }
 0x517   :  { %v1424_v18 = vmul.f32 %v1543_v9, %v1412_v13  ;;  %vm1416_vm14 = vcmp.ge.f32.partialorder %v1412_v13, 0.0 }
 0x518   :  { %v1409_v21 = vsel %vm1397_vm13, %v1383_v11, %v1405_v15  ;;  %v1388_v22 = vadd.f32 %v1736_v16, %v1541_v52  ;;  %v1737_v23 = vpop.f32.mrb[34].mxu1 }
 0x519   :  { %v1413_v24 = vadd.f32 %v1409_v21, %v1270_v17  ;;  %v1738_v26 = vpop.f32.mrb[35].mxu1  ;;  %v1428_v27 = vsel %vm1416_vm14, %v1412_v13, %v1424_v18 }
 0x51a   :  { %vm1398_vm0 = vcmp.ge.f32.partialorder %v1388_v22, 0.0  ;;  %v1406_v28 = vmul.f32 %v1542_v63, %v1388_v22  ;;  %v1739_v25 = vadd.f32 %v1738_v26, %v1737_v23  ;;  %1432 = vst [vmem:[#allocation8] sm:$0xff] %v1428_v27 }
 0x51b   :  { %v1425_v29 = vmul.f32 %v1543_v9, %v1413_v24  ;;  %vm1417_vm1 = vcmp.ge.f32.partialorder %v1413_v24, 0.0 }
 0x51c   :  { %v1410_v32 = vsel %vm1398_vm0, %v1388_v22, %v1406_v28  ;;  %v1393_v33 = vadd.f32 %v1739_v25, %v1541_v52 }
 0x51d   :  { %v1414_v34 = vadd.f32 %v1410_v32, %v1271_v31  ;;  %v1429_v35 = vsel %vm1417_vm1, %v1413_v24, %v1425_v29 }
 0x51e   :  { %vm1399_vm3 = vcmp.ge.f32.partialorder %v1393_v33, 0.0  ;;  %v1407_v36 = vmul.f32 %v1542_v63, %v1393_v33  ;;  %1433 = vst [vmem:[#allocation8 + $0x8] sm:$0xff] %v1429_v35 }
 0x51f   :  { %v1426_v37 = vmul.f32 %v1543_v9, %v1414_v34  ;;  %vm1418_vm4 = vcmp.ge.f32.partialorder %v1414_v34, 0.0 }
 0x520   :  { %v1411_v39 = vsel %vm1399_vm3, %v1393_v33, %v1407_v36 }
 0x521   :  { %v1415_v40 = vadd.f32 %v1411_v39, %v1272_v38  ;;  %v1430_v41 = vsel %vm1418_vm4, %v1414_v34, %v1426_v37 }
 0x522   :  { %1434 = vst [vmem:[#allocation8 + $0x10] sm:$0xff] %v1430_v41 }
 0x523   :  { %v1427_v42 = vmul.f32 %v1543_v9, %v1415_v40  ;;  %vm1419_vm5 = vcmp.ge.f32.partialorder %v1415_v40, 0.0 }
 0x525   :  { %v1431_v43 = vsel %vm1419_vm5, %v1415_v40, %v1427_v42 }
 0x526   :  { %1435 = vst [vmem:[#allocation8 + $0x18] sm:$0xff] %v1431_v43 }
 0x527   :  { %2217 = shalt.err (!%p2214_p0)
}
 0x528   :  { %s2218_s13 = scalar_lea.hbm %s2840_s9, 512 }
 0x529   :  { %p2219_p1 = scmp.ne.s32.totalorder %s2840_s9, %s2218_s13  ;;  %p2222_p2 = scmp.lt.u32.totalorder %s2218_s13, %s2840_s9 }
 0x52b   :  { %p2224_p3 = pnand %p2222_p2, %p2219_p1 }
 0x52d   :  { %2227 = shalt.err (!%p2224_p3)
}
 0x52e   :  { %1447 = dma.vmem_to_hbm [thread:$0]  %s1442_s11, 512, %s2840_s9, [#allocation4], %s2235_s19, %s2235_s19, %s2236_s20  }
 0x52f   :  { %2232 = dma.done.wait [#allocation4], 512  }
 0x530   :  { %2233 = vsyncadd [#allocation4], 4294966784 }
 0x531   :  { %1451 = vsyncpa [#allocation3], 1 }
 0x532   :  { %1452 = vsyncpa [#allocation6], 1 }
 0x533   :  { %1453 = vsyncpa [#allocation4], 1 }

</bundles_post_ra>
